<compile_context>
chip_gen: v6e
topology: v6e:2x2x1
jax: 0.10.0
libtpu: 0.0.40
codegen_flags: <defaults>
</compile_context>

<pallas_src>
import jax
import jax.numpy as jnp
from jax.experimental import pallas as pl
from jax.experimental.pallas import tpu as pltpu


def _fused_kernel(x_ref, s1_ref, b1_ref, w_ref, s2_ref, b2_ref, o_ref):
    # x_ref: (C_in, TM) tile -- channels on sublanes, pixels on lanes.
    x = x_ref[...].astype(jnp.float32)
    # BN1 (folded) + ReLU; scale/bias are (C_in, 1) column vectors (lane broadcast)
    h = jnp.maximum(x * s1_ref[...] + b1_ref[...], 0.0)
    # 1x1 conv == channel matmul: (C_out, C_in) @ (C_in, TM) -> (C_out, TM), lane-dense
    y = jnp.dot(w_ref[...], h, preferred_element_type=jnp.float32)
    # BN2 (folded, conv bias folded in) + ReLU
    y = jnp.maximum(y * s2_ref[...] + b2_ref[...], 0.0)
    # Dropout(p=0.2) is identity in eval mode.
    o_ref[...] = y.astype(o_ref.dtype)


def up_transition_block(x_nchw, params, *, tile_m=4096, eps=1e-5):
    (g1, b1, m1, v1, w_conv, b_conv, g2, b2, m2, v2) = params
    N, C_in, H, W = x_nchw.shape
    C_out = w_conv.shape[0]
    HW = H * W

    # --- fold BatchNorms into per-channel scale/bias (column vectors) ---
    inv1 = g1 / jnp.sqrt(v1 + eps)
    scale1 = inv1.reshape(C_in, 1).astype(jnp.float32)
    bias1 = (b1 - m1 * inv1).reshape(C_in, 1).astype(jnp.float32)

    inv2 = g2 / jnp.sqrt(v2 + eps)
    scale2 = inv2.reshape(C_out, 1).astype(jnp.float32)
    bias2 = ((b_conv - m2) * inv2 + b2).reshape(C_out, 1).astype(jnp.float32)

    w2d = w_conv.reshape(C_out, C_in).astype(jnp.float32)        # (C_out, C_in)

    # --- layout: NCHW reshape only (channels on sublanes, pixels on lanes) ---
    x_flat = x_nchw.reshape(N, C_in, HW).astype(jnp.float32)

    # --- tile the pixel (lane) axis; pad instead of asserting divisibility ---
    LANE = 128
    tile = min(tile_m, pl.cdiv(HW, LANE) * LANE)
    tile = max(tile, LANE)
    HW_pad = pl.cdiv(HW, tile) * tile
    if HW_pad != HW:
        x_flat = jnp.pad(x_flat, ((0, 0), (0, 0), (0, HW_pad - HW)))

    grid = (N, HW_pad // tile)

    out_flat = pl.pallas_call(
        _fused_kernel,
        out_shape=jax.ShapeDtypeStruct((N, C_out, HW_pad), jnp.float32),
        grid_spec=pltpu.PrefetchScalarGridSpec(
            num_scalar_prefetch=0,
            grid=grid,
            in_specs=[
                pl.BlockSpec((None, C_in, tile), lambda n, i: (n, 0, i)),
                pl.BlockSpec((C_in, 1), lambda n, i: (0, 0)),
                pl.BlockSpec((C_in, 1), lambda n, i: (0, 0)),
                pl.BlockSpec((C_out, C_in), lambda n, i: (0, 0)),
                pl.BlockSpec((C_out, 1), lambda n, i: (0, 0)),
                pl.BlockSpec((C_out, 1), lambda n, i: (0, 0)),
            ],
            out_specs=pl.BlockSpec((None, C_out, tile), lambda n, i: (n, 0, i)),
        ),
        compiler_params=pltpu.CompilerParams(
            dimension_semantics=("parallel", "parallel")),
    )(x_flat, scale1, bias1, w2d, scale2, bias2)

    # un-pad, restore spatial dims
    out = out_flat[:, :, :HW].reshape(N, C_out, H, W)
    # nearest-neighbor 2x upsample commutes with the per-pixel fused chain, so it
    # is done last (pure replication of the already-computed output).
    out = jnp.repeat(jnp.repeat(out, 2, axis=2), 2, axis=3)      # (N, C_out, 2H, 2W)
    return out


def _reference(x_nchw, params, eps=1e-5):
    (g1, b1, m1, v1, w_conv, b_conv, g2, b2, m2, v2) = params
    x = jnp.repeat(jnp.repeat(x_nchw, 2, axis=2), 2, axis=3)     # upsample NCHW
    bn1 = (x - m1[None, :, None, None]) / jnp.sqrt(v1 + eps)[None, :, None, None]
    bn1 = bn1 * g1[None, :, None, None] + b1[None, :, None, None]
    h = jnp.maximum(bn1, 0.0)
    y = jnp.einsum("nchw,oc->nohw", h,
                   w_conv.reshape(w_conv.shape[0], w_conv.shape[1]))
    y = y + b_conv[None, :, None, None]
    bn2 = (y - m2[None, :, None, None]) / jnp.sqrt(v2 + eps)[None, :, None, None]
    bn2 = bn2 * g2[None, :, None, None] + b2[None, :, None, None]
    return jnp.maximum(bn2, 0.0)   # dropout = identity in eval


if __name__ == "__main__":
    key = jax.random.PRNGKey(0)
    N, C_in, H, W = 2, 4, 16, 16
    C_out = 8

    k_x, k_w, k_b, k_g1, k_b1, k_g2, k_b2 = jax.random.split(key, 7)
    x = jax.random.normal(k_x, (N, C_in, H, W), dtype=jnp.float32)

    gamma1 = 1.0 + 0.1 * jax.random.normal(k_g1, (C_in,), dtype=jnp.float32)
    beta1 = 0.1 * jax.random.normal(k_b1, (C_in,), dtype=jnp.float32)
    mean1 = 0.05 * jnp.arange(C_in, dtype=jnp.float32)
    var1 = 1.0 + 0.1 * jnp.arange(C_in, dtype=jnp.float32)

    w_conv = 0.1 * jax.random.normal(k_w, (C_out, C_in, 1, 1), dtype=jnp.float32)
    b_conv = 0.05 * jax.random.normal(k_b, (C_out,), dtype=jnp.float32)

    gamma2 = 1.0 + 0.1 * jax.random.normal(k_g2, (C_out,), dtype=jnp.float32)
    beta2 = 0.1 * jax.random.normal(k_b2, (C_out,), dtype=jnp.float32)
    mean2 = 0.02 * jnp.arange(C_out, dtype=jnp.float32)
    var2 = 1.0 + 0.05 * jnp.arange(C_out, dtype=jnp.float32)

    params = (gamma1, beta1, mean1, var1, w_conv, b_conv,
              gamma2, beta2, mean2, var2)

    out = up_transition_block(x, params)
    out = jax.block_until_ready(out)

    ref = _reference(x, params)
    assert out.shape == (N, C_out, 2 * H, 2 * W), out.shape
    assert jnp.allclose(out, ref, atol=1e-4, rtol=1e-4), float(jnp.max(jnp.abs(out - ref)))

    print("KERNEL_OK")
</pallas_src>

<mosaic_0001>
module attributes {stable_mosaic.version = 11 : i64} {
  func.func @_fused_kernel(%arg0: i32, %arg1: i32, %arg2: memref<1x4x256xf32, #tpu.memory_space<vmem>>, %arg3: memref<4x1xf32, #tpu.memory_space<vmem>>, %arg4: memref<4x1xf32, #tpu.memory_space<vmem>>, %arg5: memref<8x4xf32, #tpu.memory_space<vmem>>, %arg6: memref<8x1xf32, #tpu.memory_space<vmem>>, %arg7: memref<8x1xf32, #tpu.memory_space<vmem>>, %arg8: memref<1x8x256xf32, #tpu.memory_space<vmem>>) attributes {dimension_semantics = [#tpu.dimension_semantics<parallel>, #tpu.dimension_semantics<parallel>], iteration_bounds = array<i64: 2, 1>, scalar_prefetch = 0 : i64, scratch_operands = 0 : i64, tpu.core_type = #tpu.core_type<tc>, window_params = [{transform_indices = @transform_0, window_bounds = array<i64: 1, 4, 256>}, {pipeline_mode = #tpu.pipeline_mode<synchronous>, transform_indices = @transform_1, window_bounds = array<i64: 4, 1>}, {pipeline_mode = #tpu.pipeline_mode<synchronous>, transform_indices = @transform_2, window_bounds = array<i64: 4, 1>}, {pipeline_mode = #tpu.pipeline_mode<synchronous>, transform_indices = @transform_3, window_bounds = array<i64: 8, 4>}, {pipeline_mode = #tpu.pipeline_mode<synchronous>, transform_indices = @transform_4, window_bounds = array<i64: 8, 1>}, {pipeline_mode = #tpu.pipeline_mode<synchronous>, transform_indices = @transform_5, window_bounds = array<i64: 8, 1>}, {transform_indices = @transform_6, window_bounds = array<i64: 1, 8, 256>}]} {
    %c0 = arith.constant 0 : index
    %c0_0 = arith.constant 0 : index
    %c0_1 = arith.constant 0 : index
    %0 = vector.load %arg2[%c0, %c0_0, %c0_1] : memref<1x4x256xf32, #tpu.memory_space<vmem>>, vector<1x4x256xf32>
    %1 = vector.shape_cast %0 : vector<1x4x256xf32> to vector<4x256xf32>
    %c0_2 = arith.constant 0 : index
    %c0_3 = arith.constant 0 : index
    %2 = vector.load %arg3[%c0_2, %c0_3] : memref<4x1xf32, #tpu.memory_space<vmem>>, vector<4x1xf32>
    %3 = vector.broadcast %2 : vector<4x1xf32> to vector<4x256xf32>
    %4 = arith.mulf %1, %3 : vector<4x256xf32>
    %c0_4 = arith.constant 0 : index
    %c0_5 = arith.constant 0 : index
    %5 = vector.load %arg4[%c0_4, %c0_5] : memref<4x1xf32, #tpu.memory_space<vmem>>, vector<4x1xf32>
    %6 = vector.broadcast %5 : vector<4x1xf32> to vector<4x256xf32>
    %7 = arith.addf %4, %6 : vector<4x256xf32>
    %cst = arith.constant 0.000000e+00 : f32
    %8 = vector.broadcast %cst : f32 to vector<4x256xf32>
    %9 = arith.maximumf %7, %8 : vector<4x256xf32>
    %c0_6 = arith.constant 0 : index
    %c0_7 = arith.constant 0 : index
    %10 = vector.load %arg5[%c0_6, %c0_7] : memref<8x4xf32, #tpu.memory_space<vmem>>, vector<8x4xf32>
    %cst_8 = arith.constant dense<0.000000e+00> : vector<8x256xf32>
    %11 = tpu.matmul %10, %9, %cst_8 {dimension_numbers = #tpu.dot_dimension_numbers<[1], [0], [0], [1], [0, 0, 1, 1], [], []>} : vector<8x4xf32>, vector<4x256xf32>, vector<8x256xf32> -> vector<8x256xf32>
    %c0_9 = arith.constant 0 : index
    %c0_10 = arith.constant 0 : index
    %12 = vector.load %arg6[%c0_9, %c0_10] : memref<8x1xf32, #tpu.memory_space<vmem>>, vector<8x1xf32>
    %13 = vector.broadcast %12 : vector<8x1xf32> to vector<8x256xf32>
    %14 = arith.mulf %11, %13 : vector<8x256xf32>
    %c0_11 = arith.constant 0 : index
    %c0_12 = arith.constant 0 : index
    %15 = vector.load %arg7[%c0_11, %c0_12] : memref<8x1xf32, #tpu.memory_space<vmem>>, vector<8x1xf32>
    %16 = vector.broadcast %15 : vector<8x1xf32> to vector<8x256xf32>
    %17 = arith.addf %14, %16 : vector<8x256xf32>
    %cst_13 = arith.constant 0.000000e+00 : f32
    %18 = vector.broadcast %cst_13 : f32 to vector<8x256xf32>
    %19 = arith.maximumf %17, %18 : vector<8x256xf32>
    %c0_14 = arith.constant 0 : index
    %c0_15 = arith.constant 0 : index
    %c0_16 = arith.constant 0 : index
    %20 = vector.load %arg8[%c0_14, %c0_15, %c0_16] : memref<1x8x256xf32, #tpu.memory_space<vmem>>, vector<1x8x256xf32>
    %21 = vector.shape_cast %20 : vector<1x8x256xf32> to vector<8x256xf32>
    %22 = vector.shape_cast %19 : vector<8x256xf32> to vector<1x8x256xf32>
    tpu.vector_store %arg8[%c0_14, %c0_15, %c0_16], %22 {strides = array<i32>} : memref<1x8x256xf32, #tpu.memory_space<vmem>>, vector<1x8x256xf32>,
    return
  }
  func.func @transform_0(%arg0: i32, %arg1: i32) -> (i32, i32, i32) {
    %c0_i32 = arith.constant 0 : i32
    %c0_i32_0 = arith.constant 0 : i32
    return %arg0, %c0_i32, %arg1 : i32, i32, i32
  }
  func.func @transform_1(%arg0: i32, %arg1: i32) -> (i32, i32) {
    %c0_i32 = arith.constant 0 : i32
    %c0_i32_0 = arith.constant 0 : i32
    %c0_i32_1 = arith.constant 0 : i32
    return %c0_i32, %c0_i32_0 : i32, i32
  }
  func.func @transform_2(%arg0: i32, %arg1: i32) -> (i32, i32) {
    %c0_i32 = arith.constant 0 : i32
    %c0_i32_0 = arith.constant 0 : i32
    %c0_i32_1 = arith.constant 0 : i32
    return %c0_i32, %c0_i32_0 : i32, i32
  }
  func.func @transform_3(%arg0: i32, %arg1: i32) -> (i32, i32) {
    %c0_i32 = arith.constant 0 : i32
    %c0_i32_0 = arith.constant 0 : i32
    %c0_i32_1 = arith.constant 0 : i32
    return %c0_i32, %c0_i32_0 : i32, i32
  }
  func.func @transform_4(%arg0: i32, %arg1: i32) -> (i32, i32) {
    %c0_i32 = arith.constant 0 : i32
    %c0_i32_0 = arith.constant 0 : i32
    %c0_i32_1 = arith.constant 0 : i32
    return %c0_i32, %c0_i32_0 : i32, i32
  }
  func.func @transform_5(%arg0: i32, %arg1: i32) -> (i32, i32) {
    %c0_i32 = arith.constant 0 : i32
    %c0_i32_0 = arith.constant 0 : i32
    %c0_i32_1 = arith.constant 0 : i32
    return %c0_i32, %c0_i32_0 : i32, i32
  }
  func.func @transform_6(%arg0: i32, %arg1: i32) -> (i32, i32, i32) {
    %c0_i32 = arith.constant 0 : i32
    %c0_i32_0 = arith.constant 0 : i32
    return %arg0, %c0_i32, %arg1 : i32, i32, i32
  }
}

</mosaic_0001>

<bundles_post_ra>
// kernel: tpu_custom_call.1
= control target key start
LH: loop header
LB: loop body
LE: loop exit
PB: predicated region body
PF: predicated region fallthrough
CT: control target
= control target key end

     0   :  { %11 = vsyncpa [#allocation3], 0  ;;  %s816_s0 = inlined_call_operand.vmem [shape: f32[2,4,256], index: 0, kind: input, shape index: {}]   ;;  %s817_s1 = inlined_call_operand.vmem [shape: f32[4,1], index: 1, kind: input, shape index: {}]   ;;  %s818_s2 = inlined_call_operand.vmem [shape: f32[4,1], index: 2, kind: input, shape index: {}]   ;;  %s819_s3 = inlined_call_operand.vmem [shape: f32[8,4], index: 3, kind: input, shape index: {}]   ;;  %s820_s4 = inlined_call_operand.vmem [shape: f32[8,1], index: 4, kind: input, shape index: {}]   ;;  %s821_s5 = inlined_call_operand.vmem [shape: f32[8,1], index: 5, kind: input, shape index: {}]   ;;  %s822_s6 = inlined_call_operand.hbm [shape: f32[2,8,256], index: 6, kind: output, shape index: {}]  }
   0x1   :  { %13 = vsyncpa [#allocation3 + $0x1], 0  ;;  %s702_s21 = smov 0   ;;  %s704_s22 = smov 0  }
   0x2   :  { %s706_s23 = smov 0   ;;  %s708_s24 = smov 0  }
   0x3   :  { %s710_s25 = smov 0   ;;  %s712_s26 = smov 0  }
   0x4 LB: > { %s507_s27 = sadd.s32 4294967295, %s661_s26   ;;  %s508_s28 = sadd.s32 4294967294, %s661_s26   ;;  %s661_s26 = sphi %s712_s26, %s19_s26   ;;  %s657_s25 = sphi %s710_s25, %s829_s25   ;;  %s653_s24 = sphi %s708_s24, %s828_s24   ;;  %s649_s23 = sphi %s706_s23, %s827_s23   ;;  %s645_s22 = sphi %s704_s22, %s826_s22   ;;  %s641_s21 = sphi %s702_s21, %s825_s21  }
   0x5   : > { %s31_s29 = sadd.s32 1, %s657_s25  ;;  %s173_s30 = sadd.s32 1, %s649_s23 }
   0x6   : > { %p33_p0 = scmp.ge.s32.totalorder %s31_s29, 2  ;;  %p183_p1 = scmp.ne.s32.totalorder %s649_s23, %s645_s22 }
   0x7   : > { %p184_p2 = scmp.eq.s32.totalorder %s507_s27, 1  ;;  %p189_p3 = scmp.ne.s32.totalorder %s645_s22, %s641_s21 }
   0x8   : > { %s831_s29 = smov (%p33_p0, %s31_s29), 0  ;;  %p190_p5 = scmp.eq.s32.totalorder %s508_s28, 1 }
   0x9   : > { %p742_p4 = por %p184_p2, %p183_p1  ;;  %s168_s8 = ssub.s32 %s657_s25, %s831_s29 }
   0xa   : > { %p511_p6 = scmp.ge.s32.totalorder %s661_s26, 1  ;;  %p171_p7 = scmp.eq.s32.totalorder %s168_s8, 0 }
   0xb   : > { %p749_p8 = por %p190_p5, %p189_p3  ;;  %p236_p9 = scmp.lt.s32.totalorder %s661_s26, 3 }
   0xc   : > { %s755_s10 = scalar_select %p171_p7, %s649_s23, %s173_s30  }
   0xd   : > { %p237_p10 = pnand %p511_p6, %p236_p9 }
   0xe   : > { %p271_p11 = scmp.lt.s32.totalorder (!%p237_p10), %s653_s24, 1  ;;  %s267_s12 = sand.u32 (!%p237_p10), 1, %s645_s22  }
   0xf   : > { %240 = sbr.rel (%p237_p10) target bundleno = 374 (0x176), region = 44  ;;  %s512_s13 = sshll.u32 (!%p237_p10), %s267_s12, 4 }
  0x10   : > { %s524_s14 = sshll.u32 (!%p237_p10), %s653_s24, 8  ;;  %s269_s15 = scalar_lea.vmem (!%p237_p10), [#allocation2], %s512_s13 }
  0x11   : > { %s431_s16 = sshll.u32 (!%p237_p10), %s269_s15, 4  ;;  %s666_s28 = smov (!%p237_p10), [#allocation2]   ;;  %s432_s16 = int_to_ptr.vmem [resolvable:$true] %s431_s16 }
  0x12   : > { %s585_s27 = scalar_lea.vmem (!%p237_p10), %s432_s16, 256 }
  0x13   : > { %p586_p12 = scmp.ne.s32.totalorder (!%p237_p10), %s432_s16, %s585_s27 }
  0x14   : > { %v282_v0 = vld [vmem:[%s817_s1] sm:$0xf]  ;;  %v663_v1 = vmov 0   ;;  %v664_v3 = vmov 0.0   ;;  %v665_v6 = vmov 839922192   ;;  %v290_v8 = vlaneseq }
  0x15   : > { %583 = vset.pattern.permute.xlu0 %v663_v1  ;;  %584 = vset.pattern.permute.xlu1 %v663_v1  ;;  %v296_v2 = vld [vmem:[%s818_s2] sm:$0xf]  ;;  %v288_v7 = vunpack.c.l.s4 %v665_v6  ;;  %s272_s19 = scalar_select %p271_p11, %s653_s24, 1  ;;  %vm318_vm0 = vcmask 1043456   ;;  %vm314_vm1 = vcmask 31744  }
  0x16   : > { %285 = vperm.xlu0 %583, %v282_v0   ;;  %387 = vmatprep.mubr.f32.mxu0 %v664_v3  ;;  %v394_v4 = vld [vmem:[%s820_s4] sm:$0xff]  ;;  %v291_v10 = vshrl.u32 %v290_v8, 7  ;;  %p587_p13 = pnand %p586_p12, %p742_p4  ;;  %s589_s24 = sshll.u32 %s666_s28, 4  ;;  %s590_s24 = int_to_ptr.vmem [resolvable:$false] %s589_s24 }
  0x17   : > { %397 = vperm.xlu1 %584, %v394_v4   ;;  %v402_v5 = vld [vmem:[%s821_s5] sm:$0xff]  ;;  %v289_v9 = vunpack.c.0.s8 %v288_v7  ;;  %s523_s20 = sshll.u32 %s272_s19, 3  ;;  %s429_s19 = scalar_lea.hbm %s822_s6, %s524_s14 }
  0x18   : > { %s278_s30 = scalar_lea.vmem %s816_s0, %s523_s20  ;;  %v311_v21 = vld [vmem:[%s819_s3] sm:$0xff]  ;;  %s415_s20 = scalar_lea.sflag [#allocation3], %s267_s12 }
  0x19   : > { %v292_v11 = vsub.s32 %v289_v9, %v291_v10  ;;  %v281_v14 = vld [vmem:[%s278_s30] sm:$0xff]  ;;  %p588_p0 = pneg %p587_p13  ;;  %s591_s30 = scalar_lea.vmem %s590_s24, 512 }
  0x1a   : > { %299 = vperm.xlu0 %583, %v296_v2   ;;  %p592_p1 = scmp.lt.s32.totalorder %s432_s16, %s590_s24  ;;  %p593_p2 = scmp.lt.s32.totalorder %s591_s30, %s585_s27 }
  0x1b   : > { %405 = vperm.xlu1 %584, %v402_v5  }
  0x1c   : > { %p594_p3 = por %p593_p2, %p592_p1 }
  0x1e   : > { %p595_p5 = pnand %p594_p3, %p588_p0 }
  0x91   : > { %v286_v12 = vpop.permute.xlu0 %285 }
  0x92   : > { %v293_v13 = vrot.slane %v286_v12, %v292_v11  ;;  %v398_v22 = vpop.permute.xlu1 %397 }
  0x94   : > { %v295_v16 = vmul.f32 %v293_v13, %v281_v14 }
  0x95   : > { %v300_v15 = vpop.permute.xlu0 %299 }
  0x96   : > { %v307_v17 = vrot.slane %v300_v15, %v292_v11  ;;  %v406_v25 = vpop.permute.xlu1 %405 }
  0x98   : > { %v309_v18 = vadd.f32 %v307_v17, %v295_v16 }
  0x9a   : > { %v310_v19 = vmax.f32 %v309_v18, 0.0 }
  0x9c   : > { %v313_v20 = vcombine.high %v310_v19, %v310_v19 }
  0x9e   : > { %515 = vmatprep.subr.msk.mxu0 %vm318_vm0, %v313_v20 }
  0x9f   : > { %516 = vmatpush1.msk.msra.mxu0 %vm318_vm0, %v310_v19 }
  0xa0   : > { %517 = vmatmul.mubr.msk.f32.vlgmr.msra.gmra.mxu0 %vm314_vm1, %v311_v21 }
 0x160   : > { %v389_v23 = vpop.f32.mrf.mxu0 }
 0x161   : > { %v400_v24 = vmul.f32 %v398_v22, %v389_v23 }
 0x162   : > { %v391_v26 = vpop.f32.mrf.mxu0 }
 0x163   : > { %v408_v27 = vadd.f32 %v406_v25, %v400_v24  ;;  %v401_v28 = vmul.f32 %v398_v22, %v391_v26 }
 0x165   : > { %v410_v29 = vmax.f32 %v408_v27, 0.0  ;;  %v409_v30 = vadd.f32 %v406_v25, %v401_v28 }
 0x167   : > { %412 = vst [vmem:[%s269_s15] sm:$0xff] %v410_v29  ;;  %v411_v31 = vmax.f32 %v409_v30, 0.0 }
 0x169   : > { %413 = vst [vmem:[%s269_s15 + $0x8] sm:$0xff] %v411_v31 }
 0x16a   : > { %598 = shalt.err (!%p595_p5)
}
 0x16b   : > { %s599_s8 = scalar_lea.hbm %s429_s19, 256  ;;  %s603_s13 = scalar_lea.hbm %s822_s6, 512 }
 0x16c   : > { %p600_p6 = scmp.ne.s32.totalorder %s429_s19, %s599_s8  ;;  %p604_p10 = scmp.lt.s32.totalorder %s429_s19, %s822_s6 }
 0x16d   : > { %p605_p11 = scmp.lt.s32.totalorder %s603_s13, %s599_s8 }
 0x16e   : > { %p601_p7 = pnand %p600_p6, %p742_p4 }
 0x16f   : > { %p606_p12 = por %p605_p11, %p604_p10 }
 0x170   : > { %p602_p9 = pneg %p601_p7 }
 0x172   : > { %p607_p13 = pnand %p606_p12, %p602_p9 }
 0x174   : > { %610 = shalt.err (!%p607_p13)
}
 0x175   : > { %525 = dma.vmem_to_hbm [thread:$0]  (%p742_p4), %s432_s16, 256, %s429_s19, %s415_s20  }
 0x176 PF: > { %p531_p0 = scmp.ge.s32.totalorder %s661_s26, 2  ;;  %s443_s17 = sand.u32 1, %s641_s21  }
 0x177   : > { %s444_s18 = scalar_lea.sflag [#allocation3], %s443_s17 }
 0x178   : > { %p528_p1 = pnand %p531_p0, %p749_p8 }
 0x17a   : > { %p529_p2 = pneg %p528_p1 }
 0x17c   : > { %636 = dma.done.wait (%p529_p2), %s444_s18, 256  }
 0x17d   : > { %638 = vsyncadd (%p529_p2), %s444_s18, 4294967040  ;;  %s19_s26 = sadd.s32 1, %s661_s26   ;;  %s825_s21 = smov %s645_s22 }
 0x17e   : > { %p16_p3 = scmp.ge.s32.totalorder %s19_s26, 4   ;;  %s826_s22 = smov %s649_s23 }
 0x17f   : > { %s827_s23 = smov %s755_s10  ;;  %s828_s24 = smov %s657_s25 }
 0x180   : > { %s829_s25 = smov %s831_s29  ;;  %18 = sbr.rel (!%p16_p3) target bundleno = 4 (0x4), region = 79 }
 0x185   :  { %449 = vsyncpa [#allocation3], 1 }
 0x186   :  { %451 = vsyncpa [#allocation3 + $0x1], 1 }

</bundles_post_ra>
